<compile_context>
chip_gen: v5e
topology: v5e:2x2
jax: 0.10.0
libtpu: 0.0.40
codegen_flags: <defaults>
</compile_context>

<pallas_src>
import functools

import jax
import jax.numpy as jnp
from jax.experimental import pallas as pl
from jax.experimental.pallas import tpu as pltpu


# op_i(a, b) = B[i,0]*1 + B[i,1]*a + B[i,2]*b + B[i,3]*a*b  for the 16 relaxed ops.
_OP_BASIS = jnp.array(
    [
        #  1     a     b    ab
        [0.0,  0.0,  0.0,  0.0],   # 0  False
        [0.0,  0.0,  0.0,  1.0],   # 1  A AND B
        [0.0,  1.0,  0.0, -1.0],   # 2  A AND NOT B
        [0.0,  1.0,  0.0,  0.0],   # 3  A
        [0.0,  0.0,  1.0, -1.0],   # 4  NOT A AND B
        [0.0,  0.0,  1.0,  0.0],   # 5  B
        [0.0,  1.0,  1.0, -2.0],   # 6  XOR
        [0.0,  1.0,  1.0, -1.0],   # 7  OR
        [1.0, -1.0, -1.0,  1.0],   # 8  NOR
        [1.0, -1.0, -1.0,  2.0],   # 9  XNOR
        [1.0,  0.0, -1.0,  0.0],   # 10 NOT B
        [1.0,  0.0, -1.0,  1.0],   # 11 A OR NOT B
        [1.0, -1.0,  0.0,  0.0],   # 12 NOT A
        [1.0, -1.0,  0.0,  1.0],   # 13 NOT A OR B
        [1.0,  0.0,  0.0, -1.0],   # 14 NAND
        [1.0,  0.0,  0.0,  0.0],   # 15 True
    ],
    dtype=jnp.float32,
)


# ----------------------------- kernels --------------------------------------


def _weighted_gates(a, b, c_ref, o_ref):
    """out = c0 + c1*a + c2*b + c3*(a*b): the 16 softmax-weighted relaxed logic
    ops collapsed onto the affine basis {1, a, b, a*b}."""
    c0 = c_ref[0:1, :]
    c1 = c_ref[1:2, :]
    c2 = c_ref[2:3, :]
    c3 = c_ref[3:4, :]
    o_ref[...] = (c0 + a * c1 + b * c2 + (a * b) * c3).astype(o_ref.dtype)


def _logic_layer_fused_kernel(xs_ref, mask_ref, c_ref, o_ref, *, n_terms, ot):
    """Fused gather-as-matmul + weighted gates.

    xs_ref:   (n_terms, bt, in_dim) bf16 -- split terms of x, precomputed in the
              wrapper (x = sum_t xs[t] to f32 accuracy with 3 terms).
    mask_ref: (in_dim, ot) int8 packed membership mask: value = a_bit + 2*b_bit.
    c_ref:    (8, ot) f32, rows 0..3 are the folded gate coefficients.
    """
    # Expand the packed mask to the two bf16 one-hot selection matrices and
    # concatenate them along N so each split term needs a single MXU dot.
    mi = mask_ref[...].astype(jnp.float32)            # values 0,1,2,3
    sel_b = (mi >= 2.0).astype(jnp.float32)           # b one-hot
    sel_a = mi - 2.0 * sel_b                          # a one-hot
    sel = jnp.concatenate([sel_a, sel_b], axis=1).astype(jnp.bfloat16)  # (in_dim, 2*ot)

    # Each one-hot column has a single nonzero, so there is no accumulation
    # error on the MXU -- only the bf16-split representation error.
    ab = jnp.dot(xs_ref[0], sel, preferred_element_type=jnp.float32)    # (bt, 2*ot)
    for t in range(1, n_terms):
        ab = ab + jnp.dot(xs_ref[t], sel, preferred_element_type=jnp.float32)

    _weighted_gates(ab[:, :ot], ab[:, ot:], c_ref, o_ref)


def _logic_layer_gather_kernel(xa_ref, xb_ref, c_ref, o_ref):
    """Memory-bound path: inputs already gathered in the wrapper."""
    _weighted_gates(xa_ref[...].astype(jnp.float32),
                    xb_ref[...].astype(jnp.float32), c_ref, o_ref)


# ----------------------------- wrapper helpers -------------------------------


def _round_up(v, m):
    return ((v + m - 1) // m) * m


def _largest_tile(dim, cap, align):
    """Largest multiple of `align` that divides `dim` and is <= cap.
    `dim` must be a positive multiple of `align` (we pad first), so this always
    returns at least `align` and never a VMEM-blowing full-dim fallback."""
    t = min(dim, (cap // align) * align)
    while t > align:
        if dim % t == 0:
            return t
        t -= align
    return align


def fold_op_coefficients(weights):
    """softmax over 16 gate logits folded into 4 affine-basis coefficients."""
    w = jax.nn.softmax(weights.astype(jnp.float32), axis=-1)     # (out_dim, 16)
    return jnp.dot(w, _OP_BASIS).T                               # (4, out_dim)


def pack_connections(a_idx, b_idx, in_dim):
    """Packed int8 membership mask: mask[i, y] = (a[y]==i) + 2*(b[y]==i).
    Connections are fixed, so build once and reuse across forward calls."""
    rows = jnp.arange(in_dim, dtype=jnp.int32)[:, None]
    a = (a_idx[None, :].astype(jnp.int32) == rows).astype(jnp.int8)
    b = (b_idx[None, :].astype(jnp.int32) == rows).astype(jnp.int8)
    return a + jnp.int8(2) * b                                   # (in_dim, out_dim)


# ----------------------------- forward ---------------------------------------


def logic_layer_forward(x, weights, a_idx, b_idx, *,
                        packed_mask=None, coeff=None,
                        force_fused=False, force_gather=False,
                        exact_gather=False, out_dtype=None):
    """x: (batch, in_dim); weights: (out_dim, 16); a_idx/b_idx: (out_dim,) int.

    packed_mask / coeff may be passed in (see pack_connections /
    fold_op_coefficients) to cache the fixed-connection / per-call-parameter
    plumbing across calls.
    """
    batch, in_dim = x.shape
    out_dim = weights.shape[0]
    out_dtype = x.dtype if out_dtype is None else out_dtype

    if coeff is None:
        coeff = fold_op_coefficients(weights)                    # (4, out_dim)

    # Pad so tile sizes are always well-aligned multiples (no huge fallback
    # blocks for prime-ish dims); the pad is sliced off at the end.
    batch_p = _round_up(batch, 16)
    out_dim_p = _round_up(out_dim, 128)
    coeff_p = jnp.pad(coeff, ((0, 4), (0, out_dim_p - out_dim)))  # (8, out_dim_p)

    # Tile selection: bt<=256, ot<=512 keeps the double-buffered footprint
    # (~7 MiB worst case) well under every generation's scoped VMEM.
    bt = _largest_tile(batch_p, 256, 16)
    ot = _largest_tile(out_dim_p, 512, 128)
    # v7x megacore: if the whole batch fits one block, split out_dim so at
    # least one parallel grid axis has >= 2 iterations.
    if batch_p // bt < 2 and out_dim_p // ot < 2 and out_dim_p >= 256:
        ot = _largest_tile(out_dim_p, out_dim_p // 2, 128)
    grid = (out_dim_p // ot, batch_p // bt)      # out_dim outer, batch inner
    cparams = pltpu.CompilerParams(
        dimension_semantics=("parallel", "parallel"),
        vmem_limit_bytes=32 * 1024 * 1024)

    # Fused (MXU one-hot gather) path only where it pays: not for tiny in_dim
    # (wasted systolic depth) nor very wide in_dim (loses to the memory-bound
    # gathered path, especially on v5e).
    use_fused = force_fused or ((not force_gather) and (128 <= in_dim <= 512))

    if use_fused:
        if packed_mask is None:
            packed_mask = pack_connections(a_idx, b_idx, in_dim)
        mask_p = jnp.pad(packed_mask, ((0, 0), (0, out_dim_p - out_dim)))

        # bf16 multi-term split of x, computed once here (not per grid step).
        # 2 terms (default): abs gather error <~1e-5 for x in [0,1].
        # 3 terms (exact_gather=True): f32-exact. bf16 inputs need no split.
        if x.dtype == jnp.bfloat16:
            terms = [x]
        else:
            xf = x.astype(jnp.float32)
            x1 = xf.astype(jnp.bfloat16)
            r1 = xf - x1.astype(jnp.float32)
            x2 = r1.astype(jnp.bfloat16)
            terms = [x1, x2]
            if exact_gather:
                terms.append((r1 - x2.astype(jnp.float32)).astype(jnp.bfloat16))
        n_terms = len(terms)
        xs = jnp.stack(terms, axis=0)                            # (n_terms, batch, in_dim)
        xs = jnp.pad(xs, ((0, 0), (0, batch_p - batch), (0, 0)))

        kernel = functools.partial(_logic_layer_fused_kernel, n_terms=n_terms, ot=ot)
        out = pl.pallas_call(
            kernel,
            out_shape=jax.ShapeDtypeStruct((batch_p, out_dim_p), out_dtype),
            grid_spec=pltpu.PrefetchScalarGridSpec(
                num_scalar_prefetch=0,
                grid=grid,
                in_specs=[
                    # x split: block index constant across the outer (out_dim)
                    # axis -> not re-DMA'd per out_dim block.
                    pl.BlockSpec((n_terms, bt, in_dim), lambda oc, bi: (0, bi, 0)),
                    # packed int8 mask / coeff: constant across the inner
                    # (batch) axis -> fetched once per out_dim block.
                    pl.BlockSpec((in_dim, ot), lambda oc, bi: (0, oc)),
                    pl.BlockSpec((8, ot), lambda oc, bi: (0, oc)),
                ],
                out_specs=pl.BlockSpec((bt, ot), lambda oc, bi: (bi, oc)),
            ),
            compiler_params=cparams,
        )(xs, mask_p, coeff_p)
        return out[:batch, :out_dim]

    # Memory-bound fallback: gather in the wrapper, same 4-coefficient kernel.
    xa = jnp.take(x, a_idx, axis=1).astype(jnp.float32)          # (batch, out_dim)
    xb = jnp.take(x, b_idx, axis=1).astype(jnp.float32)
    xa = jnp.pad(xa, ((0, batch_p - batch), (0, out_dim_p - out_dim)))
    xb = jnp.pad(xb, ((0, batch_p - batch), (0, out_dim_p - out_dim)))
    out = pl.pallas_call(
        _logic_layer_gather_kernel,
        out_shape=jax.ShapeDtypeStruct((batch_p, out_dim_p), out_dtype),
        grid_spec=pltpu.PrefetchScalarGridSpec(
            num_scalar_prefetch=0,
            grid=grid,
            in_specs=[
                pl.BlockSpec((bt, ot), lambda oc, bi: (bi, oc)),
                pl.BlockSpec((bt, ot), lambda oc, bi: (bi, oc)),
                pl.BlockSpec((8, ot), lambda oc, bi: (0, oc)),
            ],
            out_specs=pl.BlockSpec((bt, ot), lambda oc, bi: (bi, oc)),
        ),
        compiler_params=cparams,
    )(xa, xb, coeff_p)
    return out[:batch, :out_dim]


# ----------------------------- reference & test ------------------------------


def logic_layer_reference(x, weights, a_idx, b_idx):
    """Pure-JAX reference of the difflogic forward for validation."""
    w = jax.nn.softmax(weights, axis=-1)          # (out_dim, 16)
    a = x[:, a_idx]                               # (batch, out_dim)
    b = x[:, b_idx]
    ab = a * b
    one = jnp.ones_like(a)
    zero = jnp.zeros_like(a)
    ops = jnp.stack([
        zero, ab, a - ab, a, b - ab, b, a + b - 2 * ab, a + b - ab,
        1 - (a + b - ab), 1 - (a + b - 2 * ab), one - b, 1 - b + ab,
        one - a, 1 - a + ab, one - ab, one,
    ], axis=-1)                                   # (batch, out_dim, 16)
    return jnp.sum(ops * w[None, :, :], axis=-1)


if __name__ == "__main__":
    key = jax.random.PRNGKey(0)
    k_x, k_w, k_c = jax.random.split(key, 3)

    batch, in_dim, out_dim = 16, 32, 256

    # Inputs: relaxed bits in [0, 1]
    x = jax.random.uniform(k_x, (batch, in_dim), dtype=jnp.float32)

    # Parameters (mirrors torch.randn(out_dim, 16))
    weights = jax.random.normal(k_w, (out_dim, 16), dtype=jnp.float32)

    # Connections: randperm(2*out_dim) % in_dim, reshaped to (2, out_dim)
    perm = jax.random.permutation(k_c, 2 * out_dim) % in_dim
    conn = perm.reshape(2, out_dim).astype(jnp.int32)
    a_idx, b_idx = conn[0], conn[1]

    ref = logic_layer_reference(x, weights, a_idx, b_idx)

    # Default heuristic path (wrapper gather for this small in_dim).
    out_default = jax.block_until_ready(logic_layer_forward(x, weights, a_idx, b_idx))
    assert out_default.shape == (batch, out_dim)
    assert jnp.allclose(out_default, ref, atol=1e-5, rtol=1e-5)

    # Fused MXU path with the default 2-term bf16 split (gather error <~1e-5).
    out_fused = jax.block_until_ready(
        logic_layer_forward(x, weights, a_idx, b_idx, force_fused=True))
    assert out_fused.shape == (batch, out_dim)
    assert jnp.allclose(out_fused, ref, atol=1e-4, rtol=1e-4)

    # Fused MXU path with the f32-exact 3-term split, using cached
    # connections/coefficients (as a long-lived layer would).
    mask = pack_connections(a_idx, b_idx, in_dim)
    coeff = fold_op_coefficients(weights)
    out_exact = jax.block_until_ready(
        logic_layer_forward(x, weights, a_idx, b_idx, packed_mask=mask,
                            coeff=coeff, force_fused=True, exact_gather=True))
    assert jnp.allclose(out_exact, ref, atol=1e-5, rtol=1e-5)

    print("KERNEL_OK")
</pallas_src>

<mosaic_0001>
module attributes {stable_mosaic.version = 11 : i64} {
  func.func @_logic_layer_gather_kernel(%arg0: i32, %arg1: i32, %arg2: memref<16x128xf32, #tpu.memory_space<vmem>>, %arg3: memref<16x128xf32, #tpu.memory_space<vmem>>, %arg4: memref<8x128xf32, #tpu.memory_space<vmem>>, %arg5: memref<16x128xf32, #tpu.memory_space<vmem>>) attributes {dimension_semantics = [#tpu.dimension_semantics<parallel>, #tpu.dimension_semantics<parallel>], iteration_bounds = array<i64: 2, 1>, scalar_prefetch = 0 : i64, scratch_operands = 0 : i64, tpu.core_type = #tpu.core_type<tc>, window_params = [{transform_indices = @transform_0, window_bounds = array<i64: 16, 128>}, {transform_indices = @transform_1, window_bounds = array<i64: 16, 128>}, {transform_indices = @transform_2, window_bounds = array<i64: 8, 128>}, {transform_indices = @transform_3, window_bounds = array<i64: 16, 128>}]} {
    %c0 = arith.constant 0 : index
    %c0_0 = arith.constant 0 : index
    %0 = vector.load %arg2[%c0, %c0_0] : memref<16x128xf32, #tpu.memory_space<vmem>>, vector<16x128xf32>
    %c0_1 = arith.constant 0 : index
    %c0_2 = arith.constant 0 : index
    %1 = vector.load %arg3[%c0_1, %c0_2] : memref<16x128xf32, #tpu.memory_space<vmem>>, vector<16x128xf32>
    %c0_3 = arith.constant 0 : index
    %c0_4 = arith.constant 0 : index
    %2 = vector.load %arg4[%c0_3, %c0_4] : memref<8x128xf32, #tpu.memory_space<vmem>>, vector<1x128xf32>
    %c1 = arith.constant 1 : index
    %c0_5 = arith.constant 0 : index
    %3 = vector.load %arg4[%c1, %c0_5] : memref<8x128xf32, #tpu.memory_space<vmem>>, vector<1x128xf32>
    %c2 = arith.constant 2 : index
    %c0_6 = arith.constant 0 : index
    %4 = vector.load %arg4[%c2, %c0_6] : memref<8x128xf32, #tpu.memory_space<vmem>>, vector<1x128xf32>
    %c3 = arith.constant 3 : index
    %c0_7 = arith.constant 0 : index
    %5 = vector.load %arg4[%c3, %c0_7] : memref<8x128xf32, #tpu.memory_space<vmem>>, vector<1x128xf32>
    %6 = vector.broadcast %3 : vector<1x128xf32> to vector<16x128xf32>
    %7 = arith.mulf %0, %6 : vector<16x128xf32>
    %8 = vector.broadcast %2 : vector<1x128xf32> to vector<16x128xf32>
    %9 = arith.addf %8, %7 : vector<16x128xf32>
    %10 = vector.broadcast %4 : vector<1x128xf32> to vector<16x128xf32>
    %11 = arith.mulf %1, %10 : vector<16x128xf32>
    %12 = arith.addf %9, %11 : vector<16x128xf32>
    %13 = arith.mulf %0, %1 : vector<16x128xf32>
    %14 = vector.broadcast %5 : vector<1x128xf32> to vector<16x128xf32>
    %15 = arith.mulf %13, %14 : vector<16x128xf32>
    %16 = arith.addf %12, %15 : vector<16x128xf32>
    %c0_8 = arith.constant 0 : index
    %c0_9 = arith.constant 0 : index
    %17 = vector.load %arg5[%c0_8, %c0_9] : memref<16x128xf32, #tpu.memory_space<vmem>>, vector<16x128xf32>
    tpu.vector_store %arg5[%c0_8, %c0_9], %16 {strides = array<i32>} : memref<16x128xf32, #tpu.memory_space<vmem>>, vector<16x128xf32>,
    return
  }
  func.func @transform_0(%arg0: i32, %arg1: i32) -> (i32, i32) {
    %c0_i32 = arith.constant 0 : i32
    return %arg1, %arg0 : i32, i32
  }
  func.func @transform_1(%arg0: i32, %arg1: i32) -> (i32, i32) {
    %c0_i32 = arith.constant 0 : i32
    return %arg1, %arg0 : i32, i32
  }
  func.func @transform_2(%arg0: i32, %arg1: i32) -> (i32, i32) {
    %c0_i32 = arith.constant 0 : i32
    %c0_i32_0 = arith.constant 0 : i32
    return %c0_i32, %arg0 : i32, i32
  }
  func.func @transform_3(%arg0: i32, %arg1: i32) -> (i32, i32) {
    %c0_i32 = arith.constant 0 : i32
    return %arg1, %arg0 : i32, i32
  }
}

</mosaic_0001>

<bundles_post_ra>
// kernel: tpu_custom_call.1
= control target key start
LH: loop header
LB: loop body
LE: loop exit
PB: predicated region body
PF: predicated region fallthrough
CT: control target
= control target key end

     0   :  { %s938_s0 = inlined_call_operand.hbm [shape: f32[16,256], index: 0, kind: input, shape index: {}]   ;;  %s939_s1 = inlined_call_operand.hbm [shape: f32[16,256], index: 1, kind: input, shape index: {}]   ;;  %s940_s2 = inlined_call_operand.hbm [shape: f32[8,256], index: 2, kind: input, shape index: {}]   ;;  %s941_s3 = inlined_call_operand.hbm [shape: f32[16,256], index: 3, kind: output, shape index: {}]  }
   0x1   :  { %949 = sst [smem:[#allocation19_spill]] %s939_s1 }
   0x2   :  { %8 = vsyncpa [#allocation3], 0 }
   0x3   :  { %10 = vsyncpa [#allocation3 + $0x1], 0 }
   0x4   :  { %11 = vsyncpa [#allocation6], 0 }
   0x5   :  { %13 = vsyncpa [#allocation6 + $0x1], 0 }
   0x6   :  { %14 = vsyncpa [#allocation4], 0 }
   0x7   :  { %16 = vsyncpa [#allocation4 + $0x1], 0  ;;  %s775_s12 = smov 0   ;;  %s777_s13 = smov 0  }
   0x8   :  { %s779_s14 = smov 0   ;;  %s781_s15 = smov 0  }
   0x9   :  { %s783_s16 = smov 0   ;;  %s785_s17 = smov 0  }
   0xa LB: > { %950 = sst [smem:[#allocation12_spill]] %s727_s12  ;;  %s806_s18 = sadd.s32 4294967295, %s747_s17   ;;  %s747_s17 = sphi %s785_s17, %s22_s17   ;;  %s743_s16 = sphi %s783_s16, %s970_s16   ;;  %s739_s15 = sphi %s781_s15, %s969_s15   ;;  %s735_s14 = sphi %s779_s14, %s968_s14   ;;  %s731_s13 = sphi %s777_s13, %s972_s13   ;;  %s727_s12 = sphi %s775_s12, %s971_s12  }
   0xb   : > { %951 = sst [smem:[#allocation13_spill]] %s735_s14  ;;  %s471_s19 = sadd.s32 4294967294, %s747_s17  }
   0xc   : > { %952 = sst [smem:[#allocation14_spill]] %s743_s16  ;;  %s34_s20 = sadd.s32 1, %s743_s16 }
   0xd   : > { %953 = sst [smem:[#allocation15_spill]] %s747_s17  ;;  %s43_s21 = sadd.s32 1, %s735_s14 }
   0xe   : > { %p36_p0 = scmp.ge.s32.totalorder %s34_s20, 2  ;;  %p50_p1 = scmp.ne.s32.totalorder %s735_s14, %s731_s13 }
   0xf   : > { %p51_p2 = scmp.eq.s32.totalorder %s747_s17, 0  ;;  %p56_p3 = scmp.ne.s32.totalorder %s731_s13, %s727_s12 }
  0x10   : > { %s974_s20 = smov (%p36_p0, %s34_s20), 0  ;;  %p57_p5 = scmp.eq.s32.totalorder %s806_s18, 0 }
  0x11   : > { %954 = sst [smem:[#allocation16_spill]] %s974_s20  ;;  %p818_p4 = por %p51_p2, %p50_p1 }
  0x12   : > { %s39_s23 = ssub.s32 %s743_s16, %s974_s20  ;;  %p136_p6 = scmp.eq.s32.totalorder %s806_s18, 1 }
  0x13   : > { %p41_p7 = scmp.eq.s32.totalorder %s39_s23, 0  ;;  %p826_p8 = por %p57_p5, %p56_p3 }
  0x14   : > { %p830_p9 = por %p136_p6, %p50_p1  ;;  %p142_p10 = scmp.eq.s32.totalorder %s471_s19, 1 }
  0x15   : > { %s835_s26 = scalar_select %p41_p7, %s735_s14, %s43_s21  }
  0x16   : > { %p837_p11 = por %p142_p10, %p56_p3  ;;  %p473_p12 = scmp.ge.s32.totalorder %s747_s17, 2 }
  0x17   : > { %958 = sst [smem:[#allocation17_spill]] %s835_s26  ;;  %p511_p13 = scmp.lt.s32.totalorder %s747_s17, 2 }
  0x18   : > { %s959_s27 = scalar_select %p837_p11, 1, 0 }
  0x19   : > { %s844_s28 = sand.u32 1, %s735_s14   ;;  %s848_s30 = sshll.u32 %s743_s16, 3 }
  0x1a   : > { %960 = sst [smem:[#allocation18_spill]] %s959_s27  ;;  %s474_s29 = sshll.u32 %s844_s28, 4 }
  0x1b   : > { %p852_p0 = pnand %p511_p13, %p818_p4  ;;  %s186_s5 = sand.u32 1, %s747_s17  }
  0x1c   : > { %s962_s1 = sld [smem:[#allocation19_spill]]  ;;  %s190_s9 = scalar_lea.vmem [#allocation5], %s474_s29 }
  0x1d   : > { %s200_s10 = sshll.u32 %s190_s9, 4  ;;  %p480_p1 = scmp.ge.s32.totalorder %s747_s17, 1  ;;  %s201_s10 = int_to_ptr.vmem [resolvable:$true] %s200_s10 }
  0x1e   : > { %s187_s19 = scalar_lea.sflag [#allocation6], %s186_s5  ;;  %s749_s21 = smov 256  }
  0x1f   : > { %s750_s22 = smov 128   ;;  %s751_s23 = smov 8  }
  0x20   : > { %p227_p2 = scmp.lt.s32.totalorder %s747_s17, 3  ;;  %s173_s9 = scalar_lea.hbm %s938_s0, %s848_s30 }
  0x21   : > { %s174_s16 = sshll.u32 %s173_s9, 4  ;;  %s478_s5 = sshll.u32 %s844_s28, 3  ;;  %s175_s16 = int_to_ptr.hbm [resolvable:$true] %s174_s16 }
  0x22   : > { %s197_s8 = scalar_lea.hbm %s962_s1, %s848_s30  ;;  %p865_p3 = pnand %p480_p1, %p227_p2 }
  0x23   : > { %s198_s11 = sshll.u32 %s197_s8, 4  ;;  %s166_s1 = scalar_lea.vmem [#allocation2], %s474_s29  ;;  %s199_s11 = int_to_ptr.hbm [resolvable:$true] %s198_s11 }
  0x24   : > { %503 = dma.hbm_to_vmem [thread:$0]  (!%p852_p0), %s199_s11, 256, %s201_s10, %s187_s19, %s749_s21, %s750_s22, %s751_s23  }
  0x25   : > { %s176_s20 = sshll.u32 %s166_s1, 4  ;;  %s163_s26 = scalar_lea.sflag [#allocation3], %s844_s28  ;;  %s177_s20 = int_to_ptr.vmem [resolvable:$true] %s176_s20 }
  0x26   : > { %500 = dma.hbm_to_vmem [thread:$0]  (!%p852_p0), %s175_s16, 256, %s177_s20, %s163_s26, %s749_s21, %s750_s22, %s751_s23  }
  0x27   : > { %s218_s14 = scalar_lea.hbm %s940_s2, %s848_s30  ;;  %s214_s27 = scalar_lea.vmem [#allocation7], %s478_s5 }
  0x28   : > { %s220_s17 = sshll.u32 %s218_s14, 4  ;;  %s222_s12 = sshll.u32 %s214_s27, 4  ;;  %s221_s17 = int_to_ptr.hbm [resolvable:$true] %s220_s17  ;;  %s223_s12 = int_to_ptr.vmem [resolvable:$true] %s222_s12 }
  0x29   : > { %506 = dma.hbm_to_vmem [thread:$0]  (!%p852_p0), %s221_s17, 128, %s223_s12, %s187_s19  }
  0x2a   : > { %231 = sbr.rel (%p865_p3) target bundleno = 70 (0x46), region = 32  ;;  %s886_s1 = sand.u32 (!%p865_p3), 1, %s731_s13  }
  0x2b   : > { %s481_s16 = sshll.u32 (!%p865_p3), %s886_s1, 4  ;;  %s234_s20 = scalar_lea.sflag (!%p865_p3), [#allocation3], %s886_s1 }
  0x2c   : > { %s237_s26 = scalar_lea.vmem (!%p865_p3), [#allocation2], %s481_s16 }
  0x2f   : > { %714 = dma.done.wait (%p826_p8), %s234_s20, 256  }
  0x30   : > { %716 = vsyncadd (%p826_p8), %s234_s20, 4294967040  ;;  %s243_s12 = sand.u32 1, %s806_s18   ;;  %s247_s17 = scalar_lea.vmem [#allocation5], %s481_s16 }
  0x31   : > { %s244_s14 = scalar_lea.sflag [#allocation6], %s243_s12 }
  0x32   : > { %718 = dma.done.wait (%p826_p8), %s244_s14, 384  }
  0x33   : > { %720 = vsyncadd (%p826_p8), %s244_s14, 4294966912  ;;  %s483_s27 = sshll.u32 %s886_s1, 3  ;;  %v294_v0 = vld [vmem:[%s237_s26] sm:$0xff]  ;;  %s486_s29 = sshll.u32 %s739_s15, 3  ;;  %v295_v7 = vld [vmem:[%s237_s26 + $0x8] sm:$0xff] }
  0x34   : > { %v296_v1 = vld [vmem:[%s247_s17] sm:$0xff]  ;;  %s257_s28 = scalar_lea.vmem [#allocation7], %s483_s27  ;;  %v297_v8 = vld [vmem:[%s247_s17 + $0x8] sm:$0xff]  ;;  %s336_s30 = scalar_lea.hbm %s941_s3, %s486_s29 }
  0x35   : > { %v567_v2 = vld [vmem:[%s257_s28 + $0x1] ss:$0 sm:$0xff]  ;;  %v568_v3 = vld [vmem:[%s257_s28] ss:$0 sm:$0xff]  ;;  %v569_v4 = vld [vmem:[%s257_s28 + $0x2] ss:$0 sm:$0xff]  ;;  %v313_v5 = vmul.f32 %v296_v1, %v294_v0  ;;  %v314_v13 = vmul.f32 %v297_v8, %v295_v7 }
  0x36   : > { %v570_v6 = vld [vmem:[%s257_s28 + $0x3] ss:$0 sm:$0xff]  ;;  %v303_v9 = vmul.f32 %v567_v2, %v294_v0  ;;  %v309_v10 = vmul.f32 %v569_v4, %v296_v1  ;;  %v304_v11 = vmul.f32 %v567_v2, %v295_v7  ;;  %v310_v12 = vmul.f32 %v569_v4, %v297_v8  ;;  %s290_s15 = scalar_lea.vmem [#allocation8], %s481_s16  ;;  %s339_s19 = sshll.u32 %s336_s30, 4  ;;  %s340_s19 = int_to_ptr.hbm [resolvable:$true] %s339_s19 }
  0x37   : > { %v316_v15 = vmul.f32 %v570_v6, %v313_v5  ;;  %s337_s4 = sshll.u32 %s290_s15, 4  ;;  %v317_v17 = vmul.f32 %v570_v6, %v314_v13  ;;  %s323_s21 = scalar_lea.sflag [#allocation4], %s886_s1  ;;  %s338_s4 = int_to_ptr.vmem [resolvable:$true] %s337_s4 }
  0x38   : > { %v306_v14 = vadd.f32 %v568_v3, %v303_v9  ;;  %v307_v16 = vadd.f32 %v568_v3, %v304_v11  ;;  %s675_s22 = sshra.s32 %s340_s19, 4  ;;  %s681_s8 = scalar_lea.hbm %s941_s3, 32  ;;  %s676_s22 = int_to_ptr.hbm [resolvable:$true] %s675_s22 }
  0x39   : > { %s677_s23 = scalar_lea.hbm %s676_s22, 16  ;;  %p682_p7 = scmp.lt.s32.totalorder %s676_s22, %s941_s3 }
  0x3a   : > { %v311_v18 = vadd.f32 %v309_v10, %v306_v14  ;;  %v312_v19 = vadd.f32 %v310_v12, %v307_v16  ;;  %p678_p4 = scmp.ne.s32.totalorder %s676_s22, %s677_s23  ;;  %p683_p8 = scmp.lt.s32.totalorder %s681_s8, %s677_s23 }
  0x3c   : > { %v318_v20 = vadd.f32 %v316_v15, %v311_v18  ;;  %v319_v21 = vadd.f32 %v317_v17, %v312_v19  ;;  %p679_p5 = pnand %p678_p4, %p830_p9  ;;  %p684_p10 = por %p683_p8, %p682_p7 }
  0x3e   : > { %320 = vst [vmem:[%s290_s15] sm:$0xff] %v318_v20  ;;  %p680_p6 = pneg %p679_p5 }
  0x3f   : > { %321 = vst [vmem:[%s290_s15 + $0x8] sm:$0xff] %v319_v21 }
  0x40   : > { %p685_p13 = pnand %p684_p10, %p680_p6 }
  0x42   : > { %688 = shalt.err (!%p685_p13)
}
  0x43   : > { %s752_s10 = smov 128   ;;  %s753_s11 = smov 256  }
  0x44   : > { %s754_s1 = smov 8  }
  0x45   : > { %495 = dma.vmem_to_hbm [thread:$0]  (%p830_p9), %s338_s4, 256, %s340_s19, %s323_s21, %s752_s10, %s753_s11, %s754_s1  }
  0x46 PF: > { %s964_s16 = sld [smem:[#allocation12_spill]]  ;;  %p508_p0 = pnand %p473_p12, %p837_p11 }
  0x47   : > { %s966_s26 = sld [smem:[#allocation15_spill]] }
  0x48   : > { %p509_p1 = pneg %p508_p0 }
  0x4c   : > { %s354_s12 = sand.u32 1, %s964_s16  }
  0x4d   : > { %s355_s14 = scalar_lea.sflag [#allocation4], %s354_s12 }
  0x4e   : > { %722 = dma.done.wait (%p509_p1), %s355_s14, 256  }
  0x4f   : > { %724 = vsyncadd (%p509_p1), %s355_s14, 4294967040  ;;  %s22_s17 = sadd.s32 1, %s966_s26   ;;  %s967_s27 = sld [smem:[#allocation13_spill]] }
  0x50   : > { %p19_p2 = scmp.ge.s32.totalorder %s22_s17, 4   ;;  %s968_s14 = sld [smem:[#allocation17_spill]] }
  0x51   : > { %s969_s15 = sld [smem:[#allocation14_spill]]  ;;  %s971_s12 = smov %s731_s13 }
  0x52   : > { %s970_s16 = sld [smem:[#allocation16_spill]]  ;;  %21 = sbr.rel (!%p19_p2) target bundleno = 10 (0xa), region = 101 }
  0x55   : > { %s972_s13 = smov %s967_s27 }
  0x57   :  { %361 = vsyncpa [#allocation3], 1 }
  0x58   :  { %363 = vsyncpa [#allocation3 + $0x1], 1 }
  0x59   :  { %364 = vsyncpa [#allocation6], 1 }
  0x5a   :  { %366 = vsyncpa [#allocation6 + $0x1], 1 }
  0x5b   :  { %367 = vsyncpa [#allocation4], 1 }
  0x5c   :  { %369 = vsyncpa [#allocation4 + $0x1], 1 }

</bundles_post_ra>
